<compile_context>
chip_gen: v5e
topology: v5e:2x2
jax: 0.10.0
libtpu: 0.0.40
codegen_flags: <defaults>
</compile_context>

<pallas_src>
import jax
import jax.numpy as jnp
from jax.experimental import pallas as pl
from jax.experimental.pallas import tpu as pltpu


def _sum_gram_kernel(x_ref, sum_ref, gram_ref):
    """x_ref: (1, C, TILE) f32 block.  Accumulates channel sums and raw Gram."""

    @pl.when(jnp.logical_and(pl.program_id(0) == 0, pl.program_id(1) == 0))
    def _init():
        sum_ref[...] = jnp.zeros_like(sum_ref)
        gram_ref[...] = jnp.zeros_like(gram_ref)

    x = x_ref[0]                                          # (C, TILE) f32
    sum_ref[...] += jnp.sum(x, axis=1, keepdims=True)     # (C, 1)
    # x @ x^T expressed as a contraction over the lane axis of both operands
    # (no materialized transpose through the XLU).
    gram_ref[...] += jax.lax.dot_general(
        x, x,
        dimension_numbers=(((1,), (1,)), ((), ())),
        preferred_element_type=jnp.float32,
    )


def _pick_tile(hw, c, budget_bytes=16 << 20):
    """Largest lane tile (multiple of 128) dividing hw whose double-buffered
    input fits the VMEM budget; falls back to the full hw (always legal)."""
    if hw % 128 != 0:
        return hw
    for cand in (8192, 4096, 2048, 1024, 512, 256, 128):
        if hw % cand == 0 and 2 * c * cand * 4 <= budget_bytes:
            return cand
    return 128


def _channel_sum_and_gram(x_ncl, tile_hw):
    """x_ncl: (N, C, HW) float32 -> (channel_sum (C,1), raw Gram (C,C))."""
    N, C, HW = x_ncl.shape
    assert HW % tile_hw == 0
    nt = HW // tile_hw

    # double-buffered input slab + both resident output blocks + slack,
    # capped at v7x's 64 MiB physical VMEM.
    vmem_need = 2 * C * tile_hw * 4 + 2 * C * C * 4 + 2 * C * 128 * 4 + (1 << 20)
    vmem_limit = int(min(max(vmem_need, 32 << 20), 64 << 20))

    sum_c, gram = pl.pallas_call(
        _sum_gram_kernel,
        out_shape=(
            jax.ShapeDtypeStruct((C, 1), jnp.float32),
            jax.ShapeDtypeStruct((C, C), jnp.float32),
        ),
        grid_spec=pltpu.PrefetchScalarGridSpec(
            num_scalar_prefetch=0,
            grid=(N, nt),
            in_specs=[
                pl.BlockSpec((1, C, tile_hw), lambda n, t: (n, 0, t)),
            ],
            out_specs=[
                pl.BlockSpec((C, 1), lambda n, t: (0, 0)),
                pl.BlockSpec((C, C), lambda n, t: (0, 0)),
            ],
        ),
        compiler_params=pltpu.CompilerParams(
            # both grid axes feed the same resident accumulators -> arbitrary
            dimension_semantics=("arbitrary", "arbitrary"),
            vmem_limit_bytes=vmem_limit,
        ),
    )(x_ncl)
    return sum_c, gram


def pca_project_net(features):
    """features: (N, C, H, W) float32 -> (first_compo (C,), x_mean (1, C, 1, 1))."""
    N, C, H, W = features.shape
    HW = H * W
    k = float(N * HW)

    # Free, contiguous reshape -- no HBM transpose before the kernel.
    x = features.astype(jnp.float32).reshape(N, C, HW)

    tile_hw = _pick_tile(HW, C)
    sum_c, gram = _channel_sum_and_gram(x, tile_hw)

    inv_k = 1.0 / k
    mean = sum_c * inv_k                       # (C, 1)
    cov = gram * inv_k - mean @ mean.T         # (C, C) == Xc @ Xc.T / k

    # TODO(synk): torch.eig (general, unsorted eigendecomposition) has no Pallas
    # equivalent; use symmetric eigh on the tiny CxC covariance in plain JAX and
    # return the dominant eigenvector (sign/order of torch.eig's LAPACK output is
    # unspecified anyway).
    _, eigvec = jnp.linalg.eigh(cov)
    first_compo = eigvec[:, -1]                # eigenvector of the largest eigenvalue

    x_mean = mean.reshape(1, C, 1, 1)
    return first_compo, x_mean


if __name__ == "__main__":
    key = jax.random.PRNGKey(0)
    N, C, H, W = 2, 4, 16, 16
    features = jax.random.normal(key, (N, C, H, W), dtype=jnp.float32)

    first_compo, x_mean = pca_project_net(features)
    jax.block_until_ready((first_compo, x_mean))

    # Lightweight self-check against a plain-JAX reference (centered path).
    k = float(N * H * W)
    ref_mean = (features.sum(axis=(0, 2, 3)) / k).reshape(1, C, 1, 1)
    xc = jnp.transpose(features - ref_mean, (1, 0, 2, 3)).reshape(C, -1)
    ref_cov = xc @ xc.T / k
    _, ref_vec = jnp.linalg.eigh(ref_cov)
    ref_first = ref_vec[:, -1]

    assert jnp.allclose(x_mean, ref_mean, rtol=1e-5, atol=1e-5)
    # eigenvector defined up to sign: check alignment, not elementwise equality
    assert abs(float(jnp.dot(first_compo, ref_first))) > 0.999
    assert abs(float(jnp.linalg.norm(first_compo)) - 1.0) < 1e-4

    print("KERNEL_OK")
</pallas_src>

<mosaic_0001>
module attributes {stable_mosaic.version = 11 : i64} {
  func.func @_sum_gram_kernel(%arg0: i32, %arg1: i32, %arg2: memref<1x4x256xf32, #tpu.memory_space<vmem>>, %arg3: memref<4x1xf32, #tpu.memory_space<vmem>>, %arg4: memref<4x4xf32, #tpu.memory_space<vmem>>) attributes {dimension_semantics = [#tpu.dimension_semantics<arbitrary>, #tpu.dimension_semantics<arbitrary>], iteration_bounds = array<i64: 2, 1>, scalar_prefetch = 0 : i64, scratch_operands = 0 : i64, tpu.core_type = #tpu.core_type<tc>, window_params = [{transform_indices = @transform_0, window_bounds = array<i64: 1, 4, 256>}, {pipeline_mode = #tpu.pipeline_mode<synchronous>, transform_indices = @transform_1, window_bounds = array<i64: 4, 1>}, {pipeline_mode = #tpu.pipeline_mode<synchronous>, transform_indices = @transform_2, window_bounds = array<i64: 4, 4>}]} {
    %c0_i32 = arith.constant 0 : i32
    %0 = arith.cmpi eq, %arg0, %c0_i32 : i32
    %c0_i32_0 = arith.constant 0 : i32
    %1 = arith.cmpi eq, %arg1, %c0_i32_0 : i32
    %2 = arith.andi %0, %1 : i1
    %3 = arith.extui %2 : i1 to i32
    %c0_i32_1 = arith.constant 0 : i32
    %4 = arith.cmpi ne, %3, %c0_i32_1 : i32
    scf.if %4 {
      %cst_13 = arith.constant 0.000000e+00 : f32
      %16 = vector.broadcast %cst_13 : f32 to vector<4x1xf32>
      %c0_14 = arith.constant 0 : index
      %c0_15 = arith.constant 0 : index
      %17 = vector.load %arg3[%c0_14, %c0_15] : memref<4x1xf32, #tpu.memory_space<vmem>>, vector<4x1xf32>
      tpu.vector_store %arg3[%c0_14, %c0_15], %16 {strides = array<i32>} : memref<4x1xf32, #tpu.memory_space<vmem>>, vector<4x1xf32>,
      %cst_16 = arith.constant 0.000000e+00 : f32
      %18 = vector.broadcast %cst_16 : f32 to vector<4x4xf32>
      %c0_17 = arith.constant 0 : index
      %c0_18 = arith.constant 0 : index
      %19 = vector.load %arg4[%c0_17, %c0_18] : memref<4x4xf32, #tpu.memory_space<vmem>>, vector<4x4xf32>
      tpu.vector_store %arg4[%c0_17, %c0_18], %18 {strides = array<i32>} : memref<4x4xf32, #tpu.memory_space<vmem>>, vector<4x4xf32>,
    } else {
    }
    %c0 = arith.constant 0 : index
    %c0_2 = arith.constant 0 : index
    %c0_3 = arith.constant 0 : index
    %5 = vector.load %arg2[%c0, %c0_2, %c0_3] : memref<1x4x256xf32, #tpu.memory_space<vmem>>, vector<1x4x256xf32>
    %6 = vector.shape_cast %5 : vector<1x4x256xf32> to vector<4x256xf32>
    %c0_4 = arith.constant 0 : index
    %c0_5 = arith.constant 0 : index
    %7 = vector.load %arg3[%c0_4, %c0_5] : memref<4x1xf32, #tpu.memory_space<vmem>>, vector<4x1xf32>
    %cst = arith.constant dense<0.000000e+00> : vector<4xf32>
    %8 = vector.multi_reduction <add>, %6, %cst [1] : vector<4x256xf32> to vector<4xf32>
    %9 = vector.shape_cast %8 : vector<4xf32> to vector<4x1xf32>
    %10 = arith.addf %7, %9 : vector<4x1xf32>
    %c0_6 = arith.constant 0 : index
    %c0_7 = arith.constant 0 : index
    %11 = vector.load %arg3[%c0_6, %c0_7] : memref<4x1xf32, #tpu.memory_space<vmem>>, vector<4x1xf32>
    tpu.vector_store %arg3[%c0_6, %c0_7], %10 {strides = array<i32>} : memref<4x1xf32, #tpu.memory_space<vmem>>, vector<4x1xf32>,
    %c0_8 = arith.constant 0 : index
    %c0_9 = arith.constant 0 : index
    %12 = vector.load %arg4[%c0_8, %c0_9] : memref<4x4xf32, #tpu.memory_space<vmem>>, vector<4x4xf32>
    %cst_10 = arith.constant dense<0.000000e+00> : vector<4x4xf32>
    %13 = tpu.matmul %6, %6, %cst_10 {dimension_numbers = #tpu.dot_dimension_numbers<[1], [1], [0], [0], [0, 0, 1, 0], [], []>} : vector<4x256xf32>, vector<4x256xf32>, vector<4x4xf32> -> vector<4x4xf32>
    %14 = arith.addf %12, %13 : vector<4x4xf32>
    %c0_11 = arith.constant 0 : index
    %c0_12 = arith.constant 0 : index
    %15 = vector.load %arg4[%c0_11, %c0_12] : memref<4x4xf32, #tpu.memory_space<vmem>>, vector<4x4xf32>
    tpu.vector_store %arg4[%c0_11, %c0_12], %14 {strides = array<i32>} : memref<4x4xf32, #tpu.memory_space<vmem>>, vector<4x4xf32>,
    return
  }
  func.func @transform_0(%arg0: i32, %arg1: i32) -> (i32, i32, i32) {
    %c0_i32 = arith.constant 0 : i32
    %c0_i32_0 = arith.constant 0 : i32
    return %arg0, %c0_i32, %arg1 : i32, i32, i32
  }
  func.func @transform_1(%arg0: i32, %arg1: i32) -> (i32, i32) {
    %c0_i32 = arith.constant 0 : i32
    %c0_i32_0 = arith.constant 0 : i32
    %c0_i32_1 = arith.constant 0 : i32
    return %c0_i32, %c0_i32_0 : i32, i32
  }
  func.func @transform_2(%arg0: i32, %arg1: i32) -> (i32, i32) {
    %c0_i32 = arith.constant 0 : i32
    %c0_i32_0 = arith.constant 0 : i32
    %c0_i32_1 = arith.constant 0 : i32
    return %c0_i32, %c0_i32_0 : i32, i32
  }
}

</mosaic_0001>

<bundles_post_ra>
// kernel: tpu_custom_call.1
= control target key start
LH: loop header
LB: loop body
LE: loop exit
PB: predicated region body
PF: predicated region fallthrough
CT: control target
= control target key end

     0   :  { %8 = vsyncpa [#allocation3], 0  ;;  %s632_s0 = inlined_call_operand.hbm [shape: f32[2,4,256], index: 0, kind: input, shape index: {}]   ;;  %s633_s1 = inlined_call_operand.vmem [shape: f32[4,1], index: 1, kind: output, shape index: {0}]   ;;  %s634_s2 = inlined_call_operand.hbm [shape: f32[4,4], index: 2, kind: output, shape index: {1}]  }
   0x1   :  { %10 = vsyncpa [#allocation3 + $0x1], 0 }
   0x2   :  { %11 = vsyncpa [#allocation4], 0  ;;  %s532_s9 = smov 0   ;;  %s534_s10 = smov 0  }
   0x3   :  { %s536_s11 = smov 0   ;;  %s538_s12 = smov 0  }
   0x4   :  { %s540_s13 = smov 0   ;;  %s542_s14 = smov 0  }
   0x5 LB: > { %s323_s15 = sadd.s32 4294967295, %s513_s14   ;;  %s29_s16 = sadd.s32 1, %s509_s13  ;;  %s513_s14 = sphi %s542_s14, %s17_s14   ;;  %s509_s13 = sphi %s540_s13, %s641_s13   ;;  %s505_s12 = sphi %s538_s12, %s640_s12   ;;  %s501_s11 = sphi %s536_s11, %s639_s11   ;;  %s497_s10 = sphi %s534_s10, %s638_s10   ;;  %s493_s9 = sphi %s532_s9, %s637_s9  }
   0x6   : > { %p31_p0 = scmp.ge.s32.totalorder %s29_s16, 2  ;;  %s38_s17 = sadd.s32 1, %s501_s11 }
   0x7   : > { %p45_p1 = scmp.ne.s32.totalorder %s501_s11, %s497_s10  ;;  %p46_p2 = scmp.eq.s32.totalorder %s513_s14, 0 }
   0x8   : > { %s643_s16 = smov (%p31_p0, %s29_s16), 0  ;;  %p51_p4 = scmp.ne.s32.totalorder %s497_s10, %s493_s9 }
   0x9   : > { %p568_p3 = por %p46_p2, %p45_p1  ;;  %s33_s19 = ssub.s32 %s509_s13, %s643_s16 }
   0xa   : > { %p52_p5 = scmp.eq.s32.totalorder %s323_s15, 0  ;;  %p36_p6 = scmp.eq.s32.totalorder %s33_s19, 0 }
   0xb   : > { %p348_p8 = scmp.lt.s32.totalorder %s513_s14, 2  ;;  %s117_s22 = sand.u32 1, %s501_s11  }
   0xc   : > { %p577_p7 = por %p52_p5, %p51_p4  ;;  %s336_s23 = sshll.u32 %s509_s13, 3 }
   0xd   : > { %s583_s21 = scalar_select %p36_p6, %s501_s11, %s38_s17  }
   0xe   : > { %s326_s24 = sshll.u32 %s117_s22, 3  ;;  %s128_s27 = scalar_lea.hbm %s632_s0, %s336_s23 }
   0xf   : > { %s130_s28 = sshll.u32 %s128_s27, 4  ;;  %s121_s29 = scalar_lea.vmem [#allocation2], %s326_s24  ;;  %s131_s28 = int_to_ptr.hbm [resolvable:$true] %s130_s28 }
  0x10   : > { %s132_s30 = sshll.u32 %s121_s29, 4  ;;  %p345_p9 = pnand %p348_p8, %p568_p3  ;;  %s133_s30 = int_to_ptr.vmem [resolvable:$true] %s132_s30 }
  0x11   : > { %p329_p10 = scmp.ge.s32.totalorder %s513_s14, 1  ;;  %p137_p11 = scmp.lt.s32.totalorder %s513_s14, 3 }
  0x12   : > { %s118_s3 = scalar_lea.sflag [#allocation3], %s117_s22 }
  0x13   : > { %347 = dma.hbm_to_vmem [thread:$0]  (!%p345_p9), %s131_s28, 128, %s133_s30, %s118_s3  }
  0x14   : > { %p138_p12 = pnand %p329_p10, %p137_p11 }
  0x15   : > { %s143_s4 = sand.u32 (!%p138_p12), 1, %s497_s10  }
  0x16   : > { %141 = sbr.rel (%p138_p12) target bundleno = 197 (0xc5), region = 24  ;;  %s330_s5 = sshll.u32 (!%p138_p12), %s143_s4, 3 }
  0x17   : > { %s144_s6 = scalar_lea.sflag (!%p138_p12), [#allocation3], %s143_s4  ;;  %s147_s7 = scalar_lea.vmem (!%p138_p12), [#allocation2], %s330_s5 }
  0x1b   : > { %484 = dma.done.wait (%p577_p7), %s144_s6, 128  }
  0x1c   : > { %486 = vsyncadd (%p577_p7), %s144_s6, 4294967168  ;;  %p165_p13 = scmp.eq.s32.totalorder %s505_s12, 0 }
  0x1d   : > { %vm171_vm0 = vcmask (%p165_p13), 3072   ;;  %vm173_vm1 = vcmask (%p165_p13), 27648   ;;  %v515_v0 = vmov (%p165_p13), 0.0  }
  0x1e   : > { %170 = sbr.rel (!%p165_p13) target bundleno = 35 (0x23), region = 32  ;;  %172 = vst.msk [vmem:[%s633_s1] sm:$0xf] (%p165_p13), %vm171_vm0, %v515_v0 }
  0x1f   : > { %174 = vst.msk [vmem:[#allocation5] sm:$0xf] (%p165_p13), %vm173_vm1, %v515_v0 }
  0x23 PF: > { %v175_v1 = vld [vmem:[%s147_s7] sm:$0xff]  ;;  %vm183_vm2 = vcmask 1043456   ;;  %vm190_vm3 = vcmask 3072   ;;  %s516_s20 = smov [#allocation5]   ;;  %s257_s25 = sshll.u32 %s634_s2, 4  ;;  %vm244_vm4 = vcmask 27648   ;;  %s258_s25 = int_to_ptr.hbm [resolvable:$true] %s257_s25 }
  0x24   : > { %178 = vst [vmem:[#allocation1] ss:$2 sm:$0xff] %v175_v1  ;;  %s255_s22 = sshll.u32 %s516_s20, 4  ;;  %p349_p0 = scmp.eq.s32.totalorder %s323_s15, 1  ;;  %s256_s22 = int_to_ptr.vmem [resolvable:$true] %s255_s22 }
  0x25   : > { %v176_v11 = vld [vmem:[%s633_s1] sm:$0xf] }
  0x26   : > { %v192_v15 = vld [vmem:[#allocation5] sm:$0xf] }
  0x2b   : > { %v179_v2 = vld.sshfl [vmem:[#allocation1] sm:$0xff pattern:$0x75316420]  ;;  %v180_v3 = vld.sshfl [vmem:[#allocation1 + $0x8] sm:$0xff pattern:$0x75316420] }
  0x2c   : > { %193 = vst [vmem:[#allocation1] ss:$2 sm:$0xff] %v175_v1  ;;  %v184_v4 = vsel %vm183_vm2, %v179_v2, 0.0  ;;  %v185_v5 = vsel %vm183_vm2, %v180_v3, 0.0 }
  0x2d   : > { %v186_v6 = vadd.f32 %v185_v5, %v184_v4 }
  0x2f   : > { %187 = vadd.xlane.f32.xlu0 %v186_v6 }
  0x33   : > { %v194_v7 = vld.sshfl [vmem:[#allocation1] sm:$0xff pattern:$0x75316420]  ;;  %v195_v8 = vld.sshfl [vmem:[#allocation1 + $0x8] sm:$0xff pattern:$0x75316420] }
  0x34   : > { %198 = vst [vmem:[#allocation1] ss:$2 sm:$0xff] %v175_v1 }
  0x3b   : > { %v199_v9 = vld.sshfl [vmem:[#allocation1] sm:$0xff pattern:$0x75316420]  ;;  %v200_v10 = vld.sshfl [vmem:[#allocation1 + $0x8] sm:$0xff pattern:$0x75316420] }
  0x3c   : > { %218 = vmatpush.xpose.msra.mxu0 %v199_v9  ;;  %238 = vmatpush.xpose.msra.mxu1 %v200_v10 }
  0x3f   : > { %219 = vmatmul.f32.vlgmr.msra.gmra.mxu0 %v194_v7  ;;  %239 = vmatmul.f32.vlgmr.msra.gmra.mxu1 %v195_v8 }
  0xa2   : > { %v188_v12 = vpop.xlane.xlu0 %187 }
  0xa3   : > { %v189_v13 = vadd.f32 %v188_v12, %v176_v11 }
  0xa5   : > { %191 = vst.msk [vmem:[%s633_s1] sm:$0xf] %vm190_vm3, %v189_v13 }
  0xbc   : > { %v220_v14 = vpop.f32.mrf.mxu0  ;;  %v240_v16 = vpop.f32.mrf.mxu1 }
  0xbd   : > { %v241_v17 = vadd.f32 %v240_v16, %v220_v14 }
  0xbf   : > { %v243_v18 = vadd.f32 %v241_v17, %v192_v15 }
  0xc1   : > { %245 = vst.msk [vmem:[#allocation5] sm:$0xf] %vm244_vm4, %v243_v18 }
  0xc2   : > { %341 = dma.vmem_to_hbm [thread:$0]  (%p349_p0), %s256_s22, 64, %s258_s25, [#allocation4]  }
  0xc3   : > { %488 = dma.done.wait (%p349_p0), [#allocation4], 64  }
  0xc4   : > { %490 = vsyncadd (%p349_p0), [#allocation4], 4294967232 }
  0xc5 PF: > { %s17_s14 = sadd.s32 1, %s513_s14   ;;  %s637_s9 = smov %s497_s10 }
  0xc6   : > { %p14_p1 = scmp.ge.s32.totalorder %s17_s14, 4   ;;  %s638_s10 = smov %s501_s11 }
  0xc7   : > { %s639_s11 = smov %s583_s21  ;;  %s640_s12 = smov %s509_s13 }
  0xc8   : > { %s641_s13 = smov %s643_s16  ;;  %16 = sbr.rel (!%p14_p1) target bundleno = 5 (0x5), region = 73 }
  0xcd   :  { %274 = vsyncpa [#allocation3], 1 }
  0xce   :  { %276 = vsyncpa [#allocation3 + $0x1], 1 }
  0xcf   :  { %277 = vsyncpa [#allocation4], 1 }
  0xd0   :  { %279 = vsyncpa [#allocation4 + $0x1], 1 }

</bundles_post_ra>
